<compile_context>
chip_gen: v5e
topology: v5e:2x2
jax: 0.10.0
libtpu: 0.0.40
codegen_flags: <defaults>
</compile_context>

<pallas_src>
import jax
import jax.numpy as jnp
from jax import lax
from jax.experimental import pallas as pl
from jax.experimental.pallas import tpu as pltpu


def _svd_linear_kernel(x_ref, w_ref, b_ref, ae_ref, bl_ref, o_ref, acc_ref, t_ref):
    """Grid (i, j, k): i over M tiles, j over out_features tiles, k over in_features tiles.

    x_ref : (tm, tk)      input tile
    w_ref : (tn, tk)      base weight tile, stored (out, in) -> contract on dim 1 of both
    b_ref : (1,  tn)      bias tile (added once at finalize)
    ae_ref: (r_pad, tk)   (A_full * E) tile, zero-padded rank
    bl_ref: (tn, r_pad)   B_full tile, zero-padded rank
    acc_ref: (tm, tn)     f32 accumulator for x @ W^T
    t_ref  : (tm, r_pad)  f32 accumulator for x @ (A_full*E)^T (computed on the j==0 sweep,
                          reused for all other j tiles of the same row block i)
    """
    j = pl.program_id(1)
    k = pl.program_id(2)
    nk = pl.num_programs(2)

    @pl.when(k == 0)
    def _init_acc():
        acc_ref[...] = jnp.zeros_like(acc_ref)

    @pl.when((j == 0) & (k == 0))
    def _init_t():
        t_ref[...] = jnp.zeros_like(t_ref)

    x = x_ref[...]

    # Base layer: (tm, tk) . (tn, tk) contracted on the in_features dim -> (tm, tn).
    acc_ref[...] += lax.dot_general(
        x, w_ref[...],
        dimension_numbers=(((1,), (1,)), ((), ())),
        preferred_element_type=jnp.float32)

    # LoRA first stage: independent of j, so only do it while sweeping the first output tile.
    @pl.when(j == 0)
    def _lora_stage1():
        # (tm, tk) . (r_pad, tk) contracted on in_features -> (tm, r_pad).
        t_ref[...] += lax.dot_general(
            x, ae_ref[...],
            dimension_numbers=(((1,), (1,)), ((), ())),
            preferred_element_type=jnp.float32)

    @pl.when(k == nk - 1)
    def _finalize():
        # LoRA second stage: (tm, r_pad) . (tn, r_pad) contracted on padded rank -> (tm, tn).
        lora = lax.dot_general(
            t_ref[...].astype(bl_ref.dtype), bl_ref[...],
            dimension_numbers=(((1,), (1,)), ((), ())),
            preferred_element_type=jnp.float32)
        o_ref[...] = (acc_ref[...] + lora + b_ref[...]).astype(o_ref.dtype)


def _round_up(v, m):
    return ((v + m - 1) // m) * m


def _pad2(a, rows, cols):
    pr, pc = rows - a.shape[0], cols - a.shape[1]
    if pr or pc:
        a = jnp.pad(a, ((0, pr), (0, pc)))
    return a


def svd_linear_forward(x, weight, bias, lora_active_A, lora_A, lora_E,
                       lora_active_B, lora_B, *, compute_dtype=None,
                       tm=256, tn=512, tk=512):
    """x: (..., in_f); weight: (out_f, in_f); bias: (out_f,).

    lora_active_A: (block, in_f), lora_A: (r-block, in_f), lora_E: (r, 1),
    lora_active_B: (out_f, block), lora_B: (out_f, r-block).
    compute_dtype: optional dtype (e.g. jnp.bfloat16) to cast matmul operands to;
                   accumulation stays f32, output keeps x.dtype.
    Returns (..., out_f).
    """
    # TODO(synk): for tiny problems (e.g. M*out_f < 256*256) a plain jnp fallback would beat
    # pallas_call launch overhead; this script always uses the kernel to exercise it.
    orig_dtype = x.dtype
    lead_shape = x.shape[:-1]
    in_f = x.shape[-1]
    out_f = weight.shape[0]
    x2 = x.reshape(-1, in_f)
    M = x2.shape[0]

    # Adapter prep (tiny relative to the base weight): concat + scale by E.
    A_full = jnp.concatenate([lora_active_A, lora_A], axis=0)        # (r, in_f)
    B_full = jnp.concatenate([lora_active_B, lora_B], axis=1)        # (out_f, r)
    AE = A_full * lora_E                                             # (r, in_f)
    r = A_full.shape[0]

    if compute_dtype is not None:
        x2 = x2.astype(compute_dtype)
        weight = weight.astype(compute_dtype)
        AE = AE.astype(compute_dtype)
        B_full = B_full.astype(compute_dtype)
    bias2 = bias.reshape(1, out_f).astype(jnp.float32)

    # Tile sizes: clamp to the (padded) problem size; keep lane dim multiples of 128,
    # sublane multiples of 8. Rank is zero-padded to a multiple of 128 (lane-dense).
    tm_ = min(tm, _round_up(M, 8))
    tn_ = min(tn, _round_up(out_f, 128))
    tk_ = min(tk, _round_up(in_f, 128))
    r_pad = _round_up(r, 128)
    Mp, Np, Kp = _round_up(M, tm_), _round_up(out_f, tn_), _round_up(in_f, tk_)

    xp = _pad2(x2, Mp, Kp)
    wp = _pad2(weight, Np, Kp)
    bp = _pad2(bias2, 1, Np)
    aep = _pad2(AE, r_pad, Kp)
    blp = _pad2(B_full, Np, r_pad)

    grid = (Mp // tm_, Np // tn_, Kp // tk_)

    out = pl.pallas_call(
        _svd_linear_kernel,
        out_shape=jax.ShapeDtypeStruct((Mp, Np), orig_dtype),
        grid_spec=pltpu.PrefetchScalarGridSpec(
            num_scalar_prefetch=0,
            grid=grid,
            in_specs=[
                pl.BlockSpec((tm_, tk_), lambda i, j, k: (i, k)),     # x
                pl.BlockSpec((tn_, tk_), lambda i, j, k: (j, k)),     # weight (out, in)
                pl.BlockSpec((1, tn_), lambda i, j, k: (0, j)),       # bias
                pl.BlockSpec((r_pad, tk_), lambda i, j, k: (0, k)),   # A_full * E (padded rank)
                pl.BlockSpec((tn_, r_pad), lambda i, j, k: (j, 0)),   # B_full (padded rank)
            ],
            out_specs=pl.BlockSpec((tm_, tn_), lambda i, j, k: (i, j)),
            scratch_shapes=[
                pltpu.VMEM((tm_, tn_), jnp.float32),    # base accumulator
                pltpu.VMEM((tm_, r_pad), jnp.float32),  # LoRA intermediate accumulator
            ],
        ),
        # j must be sequential per core so the cached LoRA intermediate (computed at j==0)
        # is valid for the remaining output tiles of the same row block; i stays parallel.
        compiler_params=pltpu.CompilerParams(
            dimension_semantics=("parallel", "arbitrary", "arbitrary")),
    )(xp, wp, bp, aep, blp)

    out = out[:M, :out_f]
    return out.reshape(lead_shape + (out_f,))


def _jnp_reference(x, weight, bias, lora_active_A, lora_A, lora_E, lora_active_B, lora_B):
    A_full = jnp.concatenate([lora_active_A, lora_A], axis=0)
    B_full = jnp.concatenate([lora_active_B, lora_B], axis=1)
    return x @ weight.T + bias + x @ (A_full * lora_E).T @ B_full.T


if __name__ == "__main__":
    key = jax.random.PRNGKey(0)

    # ---------------- Test 1: small shapes consistent with the module ----------------
    #   in_features=32, out_features=32, r=8, head=2 -> block_size=4, batch=8
    batch, in_f, out_f = 8, 32, 32
    r, head = 8, 2
    block = r // head

    ks = jax.random.split(key, 8)
    x = jax.random.normal(ks[0], (batch, in_f), dtype=jnp.float32)
    weight = jax.random.normal(ks[1], (out_f, in_f), dtype=jnp.float32) * 0.1
    bias = jax.random.normal(ks[2], (out_f,), dtype=jnp.float32) * 0.1
    lora_A = jax.random.normal(ks[3], (r - block, in_f), dtype=jnp.float32)
    lora_E = jax.random.normal(ks[4], (r, 1), dtype=jnp.float32)
    lora_B = jax.random.normal(ks[5], (out_f, r - block), dtype=jnp.float32)
    lora_active_A = jax.random.normal(ks[6], (block, in_f), dtype=jnp.float32)
    lora_active_B = jax.random.normal(ks[7], (out_f, block), dtype=jnp.float32)

    ref = _jnp_reference(x, weight, bias, lora_active_A, lora_A, lora_E,
                         lora_active_B, lora_B)

    # f32 compute path: tight check.
    out_f32 = svd_linear_forward(x, weight, bias, lora_active_A, lora_A, lora_E,
                                 lora_active_B, lora_B, compute_dtype=None)
    out_f32 = jax.block_until_ready(out_f32)
    assert jnp.allclose(out_f32, ref, atol=1e-3, rtol=1e-3), "f32 mismatch vs reference"

    # bf16 compute path (the performance configuration): check vs a bf16-mirrored reference.
    out_bf16 = svd_linear_forward(x, weight, bias, lora_active_A, lora_A, lora_E,
                                  lora_active_B, lora_B, compute_dtype=jnp.bfloat16)
    out_bf16 = jax.block_until_ready(out_bf16)
    A_full = jnp.concatenate([lora_active_A, lora_A], axis=0)
    B_full = jnp.concatenate([lora_active_B, lora_B], axis=1)
    xb = x.astype(jnp.bfloat16)
    wb = weight.astype(jnp.bfloat16)
    aeb = (A_full * lora_E).astype(jnp.bfloat16)
    bb = B_full.astype(jnp.bfloat16)
    t16 = jnp.dot(xb, aeb.T, preferred_element_type=jnp.float32).astype(jnp.bfloat16)
    ref16 = (jnp.dot(xb, wb.T, preferred_element_type=jnp.float32) + bias
             + jnp.dot(t16, bb.T, preferred_element_type=jnp.float32))
    assert jnp.allclose(out_bf16, ref16, atol=1e-2, rtol=1e-2), "bf16 mismatch vs reference"

    # -------- Test 2: multi-tile grid (i>1, j>1, k>1) to exercise the cached-LoRA path --------
    b2, in2, out2 = 48, 256, 384
    r2, head2 = 16, 4
    block2 = r2 // head2
    ks2 = jax.random.split(jax.random.PRNGKey(1), 8)
    x2 = jax.random.normal(ks2[0], (b2, in2), dtype=jnp.float32)
    w2 = jax.random.normal(ks2[1], (out2, in2), dtype=jnp.float32) * 0.1
    bias2 = jax.random.normal(ks2[2], (out2,), dtype=jnp.float32) * 0.1
    lA2 = jax.random.normal(ks2[3], (r2 - block2, in2), dtype=jnp.float32) * 0.1
    lE2 = jax.random.normal(ks2[4], (r2, 1), dtype=jnp.float32)
    lB2 = jax.random.normal(ks2[5], (out2, r2 - block2), dtype=jnp.float32) * 0.1
    laA2 = jax.random.normal(ks2[6], (block2, in2), dtype=jnp.float32) * 0.1
    laB2 = jax.random.normal(ks2[7], (out2, block2), dtype=jnp.float32) * 0.1

    ref2 = _jnp_reference(x2, w2, bias2, laA2, lA2, lE2, laB2, lB2)
    out2_k = svd_linear_forward(x2, w2, bias2, laA2, lA2, lE2, laB2, lB2,
                                compute_dtype=None, tm=16, tn=128, tk=128)
    out2_k = jax.block_until_ready(out2_k)
    assert jnp.allclose(out2_k, ref2, atol=5e-3, rtol=5e-3), "multi-tile f32 mismatch vs reference"

    print("KERNEL_OK")
</pallas_src>

<mosaic_0001>
module attributes {stable_mosaic.version = 11 : i64} {
  func.func @_svd_linear_kernel(%arg0: i32, %arg1: i32, %arg2: i32, %arg3: memref<8x128xf32, #tpu.memory_space<vmem>>, %arg4: memref<128x128xf32, #tpu.memory_space<vmem>>, %arg5: memref<1x128xf32, #tpu.memory_space<vmem>>, %arg6: memref<128x128xf32, #tpu.memory_space<vmem>>, %arg7: memref<128x128xf32, #tpu.memory_space<vmem>>, %arg8: memref<8x128xf32, #tpu.memory_space<vmem>>, %arg9: memref<8x128xf32, #tpu.memory_space<vmem>>, %arg10: memref<8x128xf32, #tpu.memory_space<vmem>>) attributes {dimension_semantics = [#tpu.dimension_semantics<parallel>, #tpu.dimension_semantics<arbitrary>, #tpu.dimension_semantics<arbitrary>], iteration_bounds = array<i64: 1, 1, 1>, scalar_prefetch = 0 : i64, scratch_operands = 2 : i64, tpu.core_type = #tpu.core_type<tc>, window_params = [{transform_indices = @transform_0, window_bounds = array<i64: 8, 128>}, {transform_indices = @transform_1, window_bounds = array<i64: 128, 128>}, {transform_indices = @transform_2, window_bounds = array<i64: 1, 128>}, {transform_indices = @transform_3, window_bounds = array<i64: 128, 128>}, {transform_indices = @transform_4, window_bounds = array<i64: 128, 128>}, {transform_indices = @transform_5, window_bounds = array<i64: 8, 128>}]} {
    %c0_i32 = arith.constant 0 : i32
    %0 = arith.cmpi eq, %arg2, %c0_i32 : i32
    %1 = arith.extui %0 : i1 to i32
    %c0_i32_0 = arith.constant 0 : i32
    %2 = arith.cmpi ne, %1, %c0_i32_0 : i32
    scf.if %2 {
      %cst_15 = arith.constant 0.000000e+00 : f32
      %20 = vector.broadcast %cst_15 : f32 to vector<8x128xf32>
      %c0_16 = arith.constant 0 : index
      %c0_17 = arith.constant 0 : index
      %21 = vector.load %arg9[%c0_16, %c0_17] : memref<8x128xf32, #tpu.memory_space<vmem>>, vector<8x128xf32>
      tpu.vector_store %arg9[%c0_16, %c0_17], %20 {strides = array<i32>} : memref<8x128xf32, #tpu.memory_space<vmem>>, vector<8x128xf32>,
    } else {
    }
    %c0_i32_1 = arith.constant 0 : i32
    %3 = arith.cmpi eq, %arg1, %c0_i32_1 : i32
    %c0_i32_2 = arith.constant 0 : i32
    %4 = arith.cmpi eq, %arg2, %c0_i32_2 : i32
    %5 = arith.andi %3, %4 : i1
    %6 = arith.extui %5 : i1 to i32
    %c0_i32_3 = arith.constant 0 : i32
    %7 = arith.cmpi ne, %6, %c0_i32_3 : i32
    scf.if %7 {
      %cst_15 = arith.constant 0.000000e+00 : f32
      %20 = vector.broadcast %cst_15 : f32 to vector<8x128xf32>
      %c0_16 = arith.constant 0 : index
      %c0_17 = arith.constant 0 : index
      %21 = vector.load %arg10[%c0_16, %c0_17] : memref<8x128xf32, #tpu.memory_space<vmem>>, vector<8x128xf32>
      tpu.vector_store %arg10[%c0_16, %c0_17], %20 {strides = array<i32>} : memref<8x128xf32, #tpu.memory_space<vmem>>, vector<8x128xf32>,
    } else {
    }
    %c0 = arith.constant 0 : index
    %c0_4 = arith.constant 0 : index
    %8 = vector.load %arg3[%c0, %c0_4] : memref<8x128xf32, #tpu.memory_space<vmem>>, vector<8x128xf32>
    %c0_5 = arith.constant 0 : index
    %c0_6 = arith.constant 0 : index
    %9 = vector.load %arg9[%c0_5, %c0_6] : memref<8x128xf32, #tpu.memory_space<vmem>>, vector<8x128xf32>
    %c0_7 = arith.constant 0 : index
    %c0_8 = arith.constant 0 : index
    %10 = vector.load %arg4[%c0_7, %c0_8] : memref<128x128xf32, #tpu.memory_space<vmem>>, vector<128x128xf32>
    %cst = arith.constant dense<0.000000e+00> : vector<8x128xf32>
    %11 = tpu.matmul %8, %10, %cst {dimension_numbers = #tpu.dot_dimension_numbers<[1], [1], [0], [0], [0, 0, 1, 0], [], []>} : vector<8x128xf32>, vector<128x128xf32>, vector<8x128xf32> -> vector<8x128xf32>
    %12 = arith.addf %9, %11 : vector<8x128xf32>
    %c0_9 = arith.constant 0 : index
    %c0_10 = arith.constant 0 : index
    %13 = vector.load %arg9[%c0_9, %c0_10] : memref<8x128xf32, #tpu.memory_space<vmem>>, vector<8x128xf32>
    tpu.vector_store %arg9[%c0_9, %c0_10], %12 {strides = array<i32>} : memref<8x128xf32, #tpu.memory_space<vmem>>, vector<8x128xf32>,
    %c0_i32_11 = arith.constant 0 : i32
    %14 = arith.cmpi eq, %arg1, %c0_i32_11 : i32
    %15 = arith.extui %14 : i1 to i32
    %c0_i32_12 = arith.constant 0 : i32
    %16 = arith.cmpi ne, %15, %c0_i32_12 : i32
    scf.if %16 {
      %c0_15 = arith.constant 0 : index
      %c0_16 = arith.constant 0 : index
      %20 = vector.load %arg10[%c0_15, %c0_16] : memref<8x128xf32, #tpu.memory_space<vmem>>, vector<8x128xf32>
      %c0_17 = arith.constant 0 : index
      %c0_18 = arith.constant 0 : index
      %21 = vector.load %arg6[%c0_17, %c0_18] : memref<128x128xf32, #tpu.memory_space<vmem>>, vector<128x128xf32>
      %cst_19 = arith.constant dense<0.000000e+00> : vector<8x128xf32>
      %22 = tpu.matmul %8, %21, %cst_19 {dimension_numbers = #tpu.dot_dimension_numbers<[1], [1], [0], [0], [0, 0, 1, 0], [], []>} : vector<8x128xf32>, vector<128x128xf32>, vector<8x128xf32> -> vector<8x128xf32>
      %23 = arith.addf %20, %22 : vector<8x128xf32>
      %c0_20 = arith.constant 0 : index
      %c0_21 = arith.constant 0 : index
      %24 = vector.load %arg10[%c0_20, %c0_21] : memref<8x128xf32, #tpu.memory_space<vmem>>, vector<8x128xf32>
      tpu.vector_store %arg10[%c0_20, %c0_21], %23 {strides = array<i32>} : memref<8x128xf32, #tpu.memory_space<vmem>>, vector<8x128xf32>,
    } else {
    }
    %c0_i32_13 = arith.constant 0 : i32
    %17 = arith.cmpi eq, %arg2, %c0_i32_13 : i32
    %18 = arith.extui %17 : i1 to i32
    %c0_i32_14 = arith.constant 0 : i32
    %19 = arith.cmpi ne, %18, %c0_i32_14 : i32
    scf.if %19 {
      %c0_15 = arith.constant 0 : index
      %c0_16 = arith.constant 0 : index
      %20 = vector.load %arg10[%c0_15, %c0_16] : memref<8x128xf32, #tpu.memory_space<vmem>>, vector<8x128xf32>
      %c0_17 = arith.constant 0 : index
      %c0_18 = arith.constant 0 : index
      %21 = vector.load %arg7[%c0_17, %c0_18] : memref<128x128xf32, #tpu.memory_space<vmem>>, vector<128x128xf32>
      %cst_19 = arith.constant dense<0.000000e+00> : vector<8x128xf32>
      %22 = tpu.matmul %20, %21, %cst_19 {dimension_numbers = #tpu.dot_dimension_numbers<[1], [1], [0], [0], [0, 0, 1, 0], [], []>} : vector<8x128xf32>, vector<128x128xf32>, vector<8x128xf32> -> vector<8x128xf32>
      %c0_20 = arith.constant 0 : index
      %c0_21 = arith.constant 0 : index
      %23 = vector.load %arg9[%c0_20, %c0_21] : memref<8x128xf32, #tpu.memory_space<vmem>>, vector<8x128xf32>
      %24 = arith.addf %23, %22 : vector<8x128xf32>
      %c0_22 = arith.constant 0 : index
      %c0_23 = arith.constant 0 : index
      %25 = vector.load %arg5[%c0_22, %c0_23] : memref<1x128xf32, #tpu.memory_space<vmem>>, vector<1x128xf32>
      %26 = vector.broadcast %25 : vector<1x128xf32> to vector<8x128xf32>
      %27 = arith.addf %24, %26 : vector<8x128xf32>
      %c0_24 = arith.constant 0 : index
      %c0_25 = arith.constant 0 : index
      %28 = vector.load %arg8[%c0_24, %c0_25] : memref<8x128xf32, #tpu.memory_space<vmem>>, vector<8x128xf32>
      tpu.vector_store %arg8[%c0_24, %c0_25], %27 {strides = array<i32>} : memref<8x128xf32, #tpu.memory_space<vmem>>, vector<8x128xf32>,
    } else {
    }
    return
  }
  func.func @transform_0(%arg0: i32, %arg1: i32, %arg2: i32) -> (i32, i32) {
    %c0_i32 = arith.constant 0 : i32
    return %arg0, %arg2 : i32, i32
  }
  func.func @transform_1(%arg0: i32, %arg1: i32, %arg2: i32) -> (i32, i32) {
    %c0_i32 = arith.constant 0 : i32
    return %arg1, %arg2 : i32, i32
  }
  func.func @transform_2(%arg0: i32, %arg1: i32, %arg2: i32) -> (i32, i32) {
    %c0_i32 = arith.constant 0 : i32
    %c0_i32_0 = arith.constant 0 : i32
    return %c0_i32, %arg1 : i32, i32
  }
  func.func @transform_3(%arg0: i32, %arg1: i32, %arg2: i32) -> (i32, i32) {
    %c0_i32 = arith.constant 0 : i32
    %c0_i32_0 = arith.constant 0 : i32
    return %c0_i32, %arg2 : i32, i32
  }
  func.func @transform_4(%arg0: i32, %arg1: i32, %arg2: i32) -> (i32, i32) {
    %c0_i32 = arith.constant 0 : i32
    %c0_i32_0 = arith.constant 0 : i32
    return %arg1, %c0_i32 : i32, i32
  }
  func.func @transform_5(%arg0: i32, %arg1: i32, %arg2: i32) -> (i32, i32) {
    %c0_i32 = arith.constant 0 : i32
    return %arg0, %arg1 : i32, i32
  }
}

</mosaic_0001>

<bundles_post_ra>
// kernel: tpu_custom_call.1
= control target key start
LH: loop header
LB: loop body
LE: loop exit
PB: predicated region body
PF: predicated region fallthrough
CT: control target
= control target key end

     0   :  { %10 = vsyncpa [#allocation5], 0  ;;  %s433_s0 = inlined_call_operand.hbm [shape: f32[8,128], index: 0, kind: input, shape index: {}]   ;;  %s434_s1 = inlined_call_operand.hbm [shape: f32[128,128], index: 1, kind: input, shape index: {}]   ;;  %s435_s2 = inlined_call_operand.vmem [shape: f32[1,128], index: 2, kind: input, shape index: {}]   ;;  %s436_s3 = inlined_call_operand.hbm [shape: f32[128,128], index: 3, kind: input, shape index: {}]   ;;  %s437_s4 = inlined_call_operand.hbm [shape: f32[128,128], index: 4, kind: input, shape index: {}]   ;;  %s438_s5 = inlined_call_operand.hbm [shape: f32[8,128], index: 5, kind: output, shape index: {}]  }
   0x1   :  { %11 = vsyncpa [#allocation8], 0 }
   0x2   :  { %12 = vsyncpa [#allocation11], 0  ;;  %s29_s20 = sshll.u32 %s434_s1, 4  ;;  %s30_s20 = int_to_ptr.hbm [resolvable:$true] %s29_s20 }
   0x3   :  { %13 = vsyncpa [#allocation6], 0  ;;  %s378_s21 = smov [#allocation7]   ;;  %s19_s25 = sshll.u32 %s433_s0, 4  ;;  %s20_s25 = int_to_ptr.hbm [resolvable:$true] %s19_s25 }
   0x4   :  { %s31_s22 = sshll.u32 %s378_s21, 4  ;;  %s379_s26 = smov 128   ;;  %s32_s22 = int_to_ptr.vmem [resolvable:$true] %s31_s22 }
   0x5   :  { %s380_s27 = smov 8   ;;  %s381_s28 = smov [#allocation4]  }
   0x6   :  { %37 = dma.hbm_to_vmem [thread:$0]  %s30_s20, 2048, %s32_s22, [#allocation8], %s379_s26, %s379_s26, %s380_s27  }
   0x7   :  { %s21_s29 = sshll.u32 %s381_s28, 4  ;;  %s44_s7 = sshll.u32 %s436_s3, 4  ;;  %s22_s29 = int_to_ptr.vmem [resolvable:$true] %s21_s29  ;;  %s45_s7 = int_to_ptr.hbm [resolvable:$true] %s44_s7 }
   0x8   :  { %24 = dma.hbm_to_vmem [thread:$0]  %s20_s25, 128, %s22_s29, [#allocation5]  }
   0x9   :  { %s57_s9 = sshll.u32 %s437_s4, 4  ;;  %s382_s10 = smov [#allocation9]   ;;  %s58_s9 = int_to_ptr.hbm [resolvable:$true] %s57_s9 }
   0xa   :  { %s46_s11 = sshll.u32 %s382_s10, 4  ;;  %s383_s0 = smov [#allocation10]   ;;  %s47_s11 = int_to_ptr.vmem [resolvable:$true] %s46_s11 }
   0xb   :  { %52 = dma.hbm_to_vmem [thread:$0]  %s45_s7, 2048, %s47_s11, [#allocation8], %s379_s26, %s379_s26, %s380_s27  }
   0xc   :  { %s59_s12 = sshll.u32 %s383_s0, 4  ;;  %s60_s12 = int_to_ptr.vmem [resolvable:$true] %s59_s12 }
   0xd   :  { %65 = dma.hbm_to_vmem [thread:$0]  %s58_s9, 2048, %s60_s12, [#allocation11], %s379_s26, %s379_s26, %s380_s27  }
   0xe   :  { %370 = dma.done.wait [#allocation5], 128  }
   0xf   :  { %371 = vsyncadd [#allocation5], 4294967168 }
  0x10   :  { %372 = dma.done.wait [#allocation8], 4096  }
  0x11   :  { %373 = vsyncadd [#allocation8], 4294963200 }
  0x12   :  { %374 = dma.done.wait [#allocation11], 2048  }
  0x13   :  { %375 = vsyncadd [#allocation11], 4294965248  ;;  %v152_v0 = vld [vmem:[#allocation9 + $0x78] sm:$0xff]  ;;  %v151_v1 = vld [vmem:[#allocation9 + $0x70] sm:$0xff]  ;;  %s384_s13 = smov [#allocation12]   ;;  %s230_s17 = sshll.u32 %s438_s5, 4  ;;  %s231_s17 = int_to_ptr.hbm [resolvable:$true] %s230_s17 }
  0x14   :  { %153 = vmatpush.xpose.msra.mxu1 %v152_v0  ;;  %v150_v2 = vld [vmem:[#allocation9 + $0x68] sm:$0xff]  ;;  %v149_v3 = vld [vmem:[#allocation9 + $0x60] sm:$0xff]  ;;  %v148_v4 = vld [vmem:[#allocation9 + $0x58] sm:$0xff]  ;;  %s228_s14 = sshll.u32 %s384_s13, 4  ;;  %s229_s14 = int_to_ptr.vmem [resolvable:$true] %s228_s14 }
  0x15   :  { %v147_v5 = vld [vmem:[#allocation9 + $0x50] sm:$0xff]  ;;  %v146_v6 = vld [vmem:[#allocation9 + $0x48] sm:$0xff]  ;;  %v145_v7 = vld [vmem:[#allocation9 + $0x40] sm:$0xff] }
  0x16   :  { %v144_v8 = vld [vmem:[#allocation9 + $0x38] sm:$0xff]  ;;  %v143_v11 = vld [vmem:[#allocation9 + $0x30] sm:$0xff]  ;;  %v142_v14 = vld [vmem:[#allocation9 + $0x28] sm:$0xff] }
  0x17   :  { %v194_v9 = vld [vmem:[#allocation10 + $0x78] sm:$0xff]  ;;  %v193_v12 = vld [vmem:[#allocation10 + $0x70] sm:$0xff]  ;;  %v192_v15 = vld [vmem:[#allocation10 + $0x68] sm:$0xff] }
  0x18   :  { %154 = vmatpush.xpose.msra.mxu1 %v151_v1  ;;  %v110_v10 = vld [vmem:[#allocation7 + $0x78] sm:$0xff]  ;;  %195 = vmatpush.xpose.msra.mxu2 %v194_v9  ;;  %v109_v13 = vld [vmem:[#allocation7 + $0x70] sm:$0xff]  ;;  %v108_v16 = vld [vmem:[#allocation7 + $0x68] sm:$0xff] }
  0x19   :  { %111 = vmatpush.xpose.msra.mxu0 %v110_v10  ;;  %v141_v17 = vld [vmem:[#allocation9 + $0x20] sm:$0xff]  ;;  %v140_v20 = vld [vmem:[#allocation9 + $0x18] sm:$0xff]  ;;  %v139_v23 = vld [vmem:[#allocation9 + $0x10] sm:$0xff] }
  0x1a   :  { %v191_v18 = vld [vmem:[#allocation10 + $0x60] sm:$0xff]  ;;  %v190_v21 = vld [vmem:[#allocation10 + $0x58] sm:$0xff]  ;;  %v189_v24 = vld [vmem:[#allocation10 + $0x50] sm:$0xff] }
  0x1b   :  { %v107_v19 = vld [vmem:[#allocation7 + $0x60] sm:$0xff]  ;;  %v106_v22 = vld [vmem:[#allocation7 + $0x58] sm:$0xff]  ;;  %v105_v25 = vld [vmem:[#allocation7 + $0x50] sm:$0xff] }
  0x1c   :  { %155 = vmatpush.xpose.msra.mxu1 %v150_v2  ;;  %196 = vmatpush.xpose.msra.mxu2 %v193_v12  ;;  %v138_v26 = vld [vmem:[#allocation9 + $0x8] sm:$0xff]  ;;  %v137_v29 = vld [vmem:[#allocation9] sm:$0xff]  ;;  %v93_v32 = vld [vmem:[#allocation4] sm:$0xff] }
  0x1d   :  { %112 = vmatpush.xpose.msra.mxu0 %v109_v13  ;;  %v188_v27 = vld [vmem:[#allocation10 + $0x48] sm:$0xff]  ;;  %v187_v30 = vld [vmem:[#allocation10 + $0x40] sm:$0xff]  ;;  %v186_v33 = vld [vmem:[#allocation10 + $0x38] sm:$0xff] }
  0x1e   :  { %v104_v28 = vld [vmem:[#allocation7 + $0x48] sm:$0xff]  ;;  %v103_v31 = vld [vmem:[#allocation7 + $0x40] sm:$0xff]  ;;  %v102_v34 = vld [vmem:[#allocation7 + $0x38] sm:$0xff] }
  0x1f   :  { %v185_v35 = vld [vmem:[#allocation10 + $0x30] sm:$0xff]  ;;  %v184_v37 = vld [vmem:[#allocation10 + $0x28] sm:$0xff]  ;;  %v183_v39 = vld [vmem:[#allocation10 + $0x20] sm:$0xff] }
  0x20   :  { %156 = vmatpush.xpose.msra.mxu1 %v149_v3  ;;  %197 = vmatpush.xpose.msra.mxu2 %v192_v15  ;;  %v101_v36 = vld [vmem:[#allocation7 + $0x30] sm:$0xff]  ;;  %v100_v38 = vld [vmem:[#allocation7 + $0x28] sm:$0xff]  ;;  %v99_v40 = vld [vmem:[#allocation7 + $0x20] sm:$0xff] }
  0x21   :  { %113 = vmatpush.xpose.msra.mxu0 %v108_v16  ;;  %v182_v41 = vld [vmem:[#allocation10 + $0x18] sm:$0xff]  ;;  %v181_v43 = vld [vmem:[#allocation10 + $0x10] sm:$0xff]  ;;  %v180_v45 = vld [vmem:[#allocation10 + $0x8] sm:$0xff] }
  0x22   :  { %v98_v42 = vld [vmem:[#allocation7 + $0x18] sm:$0xff]  ;;  %v97_v44 = vld [vmem:[#allocation7 + $0x10] sm:$0xff]  ;;  %v96_v46 = vld [vmem:[#allocation7 + $0x8] sm:$0xff] }
  0x23   :  { %v179_v47 = vld [vmem:[#allocation10] sm:$0xff]  ;;  %v249_v51 = vld [vmem:[%s435_s2] ss:$0 sm:$0xff] }
  0x24   :  { %157 = vmatpush.xpose.msra.mxu1 %v148_v4  ;;  %198 = vmatpush.xpose.msra.mxu2 %v191_v18  ;;  %v95_v48 = vld [vmem:[#allocation7] sm:$0xff] }
  0x25   :  { %114 = vmatpush.xpose.msra.mxu0 %v107_v19 }
  0x28   :  { %158 = vmatpush.xpose.msra.mxu1 %v147_v5  ;;  %199 = vmatpush.xpose.msra.mxu2 %v190_v21 }
  0x29   :  { %115 = vmatpush.xpose.msra.mxu0 %v106_v22 }
  0x2c   :  { %159 = vmatpush.xpose.msra.mxu1 %v146_v6  ;;  %200 = vmatpush.xpose.msra.mxu2 %v189_v24 }
  0x2d   :  { %116 = vmatpush.xpose.msra.mxu0 %v105_v25 }
  0x30   :  { %160 = vmatpush.xpose.msra.mxu1 %v145_v7  ;;  %201 = vmatpush.xpose.msra.mxu2 %v188_v27 }
  0x31   :  { %117 = vmatpush.xpose.msra.mxu0 %v104_v28 }
  0x34   :  { %161 = vmatpush.xpose.msra.mxu1 %v144_v8  ;;  %202 = vmatpush.xpose.msra.mxu2 %v187_v30 }
  0x35   :  { %118 = vmatpush.xpose.msra.mxu0 %v103_v31 }
  0x38   :  { %162 = vmatpush.xpose.msra.mxu1 %v143_v11  ;;  %203 = vmatpush.xpose.msra.mxu2 %v186_v33 }
  0x39   :  { %119 = vmatpush.xpose.msra.mxu0 %v102_v34 }
  0x3c   :  { %163 = vmatpush.xpose.msra.mxu1 %v142_v14  ;;  %204 = vmatpush.xpose.msra.mxu2 %v185_v35 }
  0x3d   :  { %120 = vmatpush.xpose.msra.mxu0 %v101_v36 }
  0x40   :  { %164 = vmatpush.xpose.msra.mxu1 %v141_v17  ;;  %205 = vmatpush.xpose.msra.mxu2 %v184_v37 }
  0x41   :  { %121 = vmatpush.xpose.msra.mxu0 %v100_v38 }
  0x44   :  { %165 = vmatpush.xpose.msra.mxu1 %v140_v20  ;;  %206 = vmatpush.xpose.msra.mxu2 %v183_v39 }
  0x45   :  { %122 = vmatpush.xpose.msra.mxu0 %v99_v40 }
  0x48   :  { %166 = vmatpush.xpose.msra.mxu1 %v139_v23  ;;  %207 = vmatpush.xpose.msra.mxu2 %v182_v41 }
  0x49   :  { %123 = vmatpush.xpose.msra.mxu0 %v98_v42 }
  0x4c   :  { %167 = vmatpush.xpose.msra.mxu1 %v138_v26  ;;  %208 = vmatpush.xpose.msra.mxu2 %v181_v43 }
  0x4d   :  { %124 = vmatpush.xpose.msra.mxu0 %v97_v44 }
  0x50   :  { %168 = vmatpush.xpose.msra.mxu1 %v137_v29  ;;  %209 = vmatpush.xpose.msra.mxu2 %v180_v45 }
  0x51   :  { %125 = vmatpush.xpose.msra.mxu0 %v96_v46 }
  0x53   :  { %169 = vmatmul.f32.vlgmr.msra.gmra.mxu1 %v93_v32 }
  0x54   :  { %210 = vmatpush.xpose.msra.mxu2 %v179_v47 }
  0x55   :  { %126 = vmatpush.xpose.msra.mxu0 %v95_v48 }
  0x58   :  { %127 = vmatmul.f32.vlgmr.msra.gmra.mxu0 %v93_v32 }
  0xd0   :  { %v170_v49 = vpop.f32.mrf.mxu1 }
  0xd1   :  { %211 = vmatmul.f32.vlgmr.msra.gmra.mxu2 %v170_v49 }
  0xd5   :  { %v128_v50 = vpop.f32.mrf.mxu0 }
 0x154   :  { %v212_v52 = vpop.f32.mrf.mxu2 }
 0x155   :  { %v216_v53 = vadd.f32 %v212_v52, %v128_v50 }
 0x157   :  { %v221_v54 = vadd.f32 %v249_v51, %v216_v53 }
 0x159   :  { %222 = vst [vmem:[#allocation12] sm:$0xff] %v221_v54 }
 0x15a   :  { %233 = dma.vmem_to_hbm [thread:$0]  %s229_s14, 128, %s231_s17, [#allocation6]  }
 0x15b   :  { %376 = dma.done.wait [#allocation6], 128  }
 0x15c   :  { %377 = vsyncadd [#allocation6], 4294967168 }
 0x15d   :  { %238 = vsyncpa [#allocation5], 1 }
 0x15e   :  { %239 = vsyncpa [#allocation8], 1 }
 0x15f   :  { %240 = vsyncpa [#allocation11], 1 }
 0x160   :  { %241 = vsyncpa [#allocation6], 1 }

</bundles_post_ra>
